<compile_context>
chip_gen: v6e
topology: v6e:2x2x1
jax: 0.10.0
libtpu: 0.0.40
codegen_flags: <defaults>
</compile_context>

<pallas_src>
import math
import functools

import jax
import jax.numpy as jnp
from jax import lax
from jax.experimental import pallas as pl
from jax.experimental.pallas import tpu as pltpu


# torchvision BoxCoder(weights=(1,1,1,1))
BOX_CODER_WEIGHTS = (1.0, 1.0, 1.0, 1.0)
BBOX_XFORM_CLIP = math.log(1000.0 / 16.0)

NEG_INF = -1e30        # sentinel for removed / invalid scores
VALID_CUTOFF = -1e29   # anything above this is a real score


# ----------------------------------------------------------------------------
# Pallas kernel 1: decode deltas against anchors + clip to image
# ----------------------------------------------------------------------------
def _decode_clip_kernel(img_ref, anch_ref, delt_ref, boxes_ref):
    wx, wy, ww, wh = BOX_CODER_WEIGHTS
    n = pl.program_id(0)

    # per-image clip bounds as SMEM scalars (image_sizes rows are (H, W))
    img_h = img_ref[n, 0]
    img_w = img_ref[n, 1]

    ax1 = anch_ref[0, 0]
    ay1 = anch_ref[0, 1]
    ax2 = anch_ref[0, 2]
    ay2 = anch_ref[0, 3]

    widths = ax2 - ax1
    heights = ay2 - ay1
    ctr_x = ax1 + 0.5 * widths
    ctr_y = ay1 + 0.5 * heights

    dx = delt_ref[0, 0] / wx
    dy = delt_ref[0, 1] / wy
    dw = jnp.minimum(delt_ref[0, 2] / ww, BBOX_XFORM_CLIP)
    dh = jnp.minimum(delt_ref[0, 3] / wh, BBOX_XFORM_CLIP)

    pred_ctr_x = dx * widths + ctr_x
    pred_ctr_y = dy * heights + ctr_y
    pred_w = jnp.exp(dw) * widths
    pred_h = jnp.exp(dh) * heights

    zero = jnp.float32(0.0)
    # clip_boxes_to_image: x in [0, W], y in [0, H]
    boxes_ref[0, 0] = jnp.clip(pred_ctr_x - 0.5 * pred_w, zero, img_w)
    boxes_ref[0, 1] = jnp.clip(pred_ctr_y - 0.5 * pred_h, zero, img_h)
    boxes_ref[0, 2] = jnp.clip(pred_ctr_x + 0.5 * pred_w, zero, img_w)
    boxes_ref[0, 3] = jnp.clip(pred_ctr_y + 0.5 * pred_h, zero, img_h)


def _decode_tiling(a_total, max_rows_per_tile=64):
    """Rows of 128 anchors.  Returns (rows_per_tile, total_rows_padded)."""
    rows = -(-a_total // 128)
    if rows <= max_rows_per_tile:
        return rows, rows                       # single tile per image
    r_tile = max_rows_per_tile                  # multiple of 8 -> dense (8,128)
    r_total = -(-rows // r_tile) * r_tile
    return r_tile, r_total


def decode_clip(anchors_soa, deltas_soa, image_hw, *, max_rows_per_tile=64):
    """anchors_soa / deltas_soa: (N, 4, A) f32; image_hw: (N, 2) f32 (H, W).
    Returns clipped decoded boxes in SoA layout (N, 4, A_pad), A_pad >= A."""
    n, _, a = anchors_soa.shape
    r_tile, r_total = _decode_tiling(a, max_rows_per_tile)
    a_pad = r_total * 128
    pad = a_pad - a

    anch = anchors_soa.astype(jnp.float32)
    delt = deltas_soa.astype(jnp.float32)
    if pad:
        anch = jnp.pad(anch, ((0, 0), (0, 0), (0, pad)))
        delt = jnp.pad(delt, ((0, 0), (0, 0), (0, pad)))
    anch = anch.reshape(n, 4, r_total, 128)
    delt = delt.reshape(n, 4, r_total, 128)

    grid = (n, r_total // r_tile)
    boxes = pl.pallas_call(
        _decode_clip_kernel,
        out_shape=jax.ShapeDtypeStruct((n, 4, r_total, 128), jnp.float32),
        grid_spec=pltpu.PrefetchScalarGridSpec(
            num_scalar_prefetch=0,
            grid=grid,
            in_specs=[
                pl.BlockSpec(memory_space=pltpu.MemorySpace.SMEM),
                pl.BlockSpec((1, 4, r_tile, 128), lambda i, r: (i, 0, r, 0)),
                pl.BlockSpec((1, 4, r_tile, 128), lambda i, r: (i, 0, r, 0)),
            ],
            out_specs=pl.BlockSpec((1, 4, r_tile, 128), lambda i, r: (i, 0, r, 0)),
        ),
        compiler_params=pltpu.CompilerParams(
            dimension_semantics=("parallel", "parallel")),
    )(image_hw.astype(jnp.float32), anch, delt)

    # padded tail is never gathered (top-k indices are < A), keep it padded
    return boxes.reshape(n, 4, a_pad)


# ----------------------------------------------------------------------------
# Pallas kernel 2: fused greedy batched-NMS (IoU rows recomputed in VMEM)
# ----------------------------------------------------------------------------
def _nms_kernel(boxes_ref, scores_ref, lvl_ref, kidx_ref, kscr_ref, ws_ref,
                *, post_n, iou_thresh):
    r = ws_ref.shape[0]

    b = boxes_ref[0]                      # (4, r, 128)
    x1 = b[0]
    y1 = b[1]
    x2 = b[2]
    y2 = b[3]
    area = (x2 - x1) * (y2 - y1)          # (r, 128)
    lvl = lvl_ref[0]                      # (r, 128) f32 (small ints, exact)

    row_i = lax.broadcasted_iota(jnp.int32, (r, 128), 0)
    col_i = lax.broadcasted_iota(jnp.int32, (r, 128), 1)
    idx_f = (row_i * 128 + col_i).astype(jnp.float32)
    slot_iota = lax.broadcasted_iota(jnp.int32, (1, post_n), 1)

    ws_ref[...] = scores_ref[0]
    kidx_ref[0] = jnp.zeros((1, post_n), jnp.float32)
    kscr_ref[0] = jnp.full((1, post_n), NEG_INF, jnp.float32)

    def _rmax(v):
        return jnp.max(jnp.max(v, axis=1, keepdims=True), axis=0, keepdims=True)

    def _rmin(v):
        return jnp.min(jnp.min(v, axis=1, keepdims=True), axis=0, keepdims=True)

    def _rsum(v):
        return jnp.sum(jnp.sum(v, axis=1, keepdims=True), axis=0, keepdims=True)

    @pl.loop(0, post_n)
    def _(i):
        s = ws_ref[...]                                        # (r, 128)
        m = _rmax(s)                                           # (1, 1)
        # lowest index among the max scores (stable tie-break)
        pick = _rmin(jnp.where(s == m, idx_f, jnp.float32(3e9)))
        onehot = idx_f == pick                                 # (r, 128)

        def _sel(v):
            return _rsum(jnp.where(onehot, v, 0.0))            # (1, 1)

        px1 = _sel(x1)
        py1 = _sel(y1)
        px2 = _sel(x2)
        py2 = _sel(y2)
        plvl = _sel(lvl)
        p_area = (px2 - px1) * (py2 - py1)

        iw = jnp.maximum(jnp.minimum(x2, px2) - jnp.maximum(x1, px1), 0.0)
        ih = jnp.maximum(jnp.minimum(y2, py2) - jnp.maximum(y1, py1), 0.0)
        inter = iw * ih
        union = area + p_area - inter
        # exact division (matches torchvision; approx reciprocal could flip
        # suppression decisions near the threshold)
        iou = inter / union

        valid = m > VALID_CUTOFF                               # (1, 1) bool
        suppress = ((iou > iou_thresh) & (lvl == plvl)) | onehot
        ws_ref[...] = jnp.where(jnp.logical_and(valid, suppress), NEG_INF, s)

        slot = slot_iota == i                                  # (1, post_n)
        kidx_ref[0] = jnp.where(slot, jnp.where(valid, pick, 0.0), kidx_ref[0])
        kscr_ref[0] = jnp.where(slot, jnp.where(valid, m, NEG_INF), kscr_ref[0])


def nms_fused(boxes_soa, scores, lvls, *, post_n, iou_thresh):
    """boxes_soa: (N, 4, K) f32; scores: (N, K) f32 (invalid = NEG_INF);
    lvls: (N, K) f32.  K must be a multiple of 128.
    Returns keep indices (N, post_n) int32 and kept scores (N, post_n) f32
    (NEG_INF marks unused slots)."""
    n, _, k = boxes_soa.shape
    r = k // 128
    boxes_r = boxes_soa.reshape(n, 4, r, 128)
    scores_r = scores.reshape(n, r, 128)
    lvls_r = lvls.reshape(n, r, 128)

    kernel = functools.partial(_nms_kernel, post_n=post_n, iou_thresh=iou_thresh)
    keep_idx_f, keep_score = pl.pallas_call(
        kernel,
        out_shape=(jax.ShapeDtypeStruct((n, 1, post_n), jnp.float32),
                   jax.ShapeDtypeStruct((n, 1, post_n), jnp.float32)),
        grid_spec=pltpu.PrefetchScalarGridSpec(
            num_scalar_prefetch=0,
            grid=(n,),
            in_specs=[pl.BlockSpec((1, 4, r, 128), lambda i: (i, 0, 0, 0)),
                      pl.BlockSpec((1, r, 128), lambda i: (i, 0, 0)),
                      pl.BlockSpec((1, r, 128), lambda i: (i, 0, 0))],
            out_specs=[pl.BlockSpec((1, 1, post_n), lambda i: (i, 0, 0)),
                       pl.BlockSpec((1, 1, post_n), lambda i: (i, 0, 0))],
            scratch_shapes=[pltpu.VMEM((r, 128), jnp.float32)],
        ),
        compiler_params=pltpu.CompilerParams(
            dimension_semantics=("parallel",)),
    )(boxes_r, scores_r, lvls_r)

    keep_idx = keep_idx_f.reshape(n, post_n).astype(jnp.int32)
    keep_score = keep_score.reshape(n, post_n)
    return keep_idx, keep_score


# ----------------------------------------------------------------------------
# Plain-JAX glue reproducing the PyTorch module control flow
# ----------------------------------------------------------------------------
def concat_box_prediction_layers_soa(objectness_list, deltas_list):
    """torchvision concat_box_prediction_layers, but deltas are produced
    directly in SoA layout: returns obj (N, A_total), deltas (N, 4, A_total).
    Per-level anchor ordering is (H, W, A), matching the anchor generator."""
    obj_flat, delt_soa = [], []
    for o, d in zip(objectness_list, deltas_list):
        n, a, h, w = o.shape
        obj_flat.append(jnp.transpose(o, (0, 2, 3, 1)).reshape(n, -1))
        d5 = d.reshape(n, a, 4, h, w)
        delt_soa.append(jnp.transpose(d5, (0, 2, 3, 4, 1)).reshape(n, 4, -1))
    return jnp.concatenate(obj_flat, axis=1), jnp.concatenate(delt_soa, axis=2)


def rpn_predictor_forward(objectness_list, deltas_list, anchors_soa,
                          image_sizes_hw, *, pre_nms_top_n, post_nms_top_n,
                          nms_thresh, score_thresh, min_size):
    """Fixed-shape equivalent of RPNPredictor.forward (eval mode, priors=None).

    anchors_soa: (N, 4, A_total) coord-major anchors.
    Returns dict with:
      boxes  : (N, post_nms_top_n, 4)
      scores : (N, post_nms_top_n)
      valid  : (N, post_nms_top_n) bool mask (padding of the variable-length
               per-image lists the PyTorch module returns)
      priors : None
    """
    # TODO(synk): priors gather/filter path not implemented (priors=None only).
    num_anchors_per_level = [o.shape[1] * o.shape[2] * o.shape[3]
                             for o in objectness_list]

    obj, deltas_soa = concat_box_prediction_layers_soa(objectness_list, deltas_list)

    # box_coder.decode + clip_boxes_to_image  (Pallas kernel 1, SoA output)
    boxes_soa = decode_clip(anchors_soa, deltas_soa, image_sizes_hw)   # (N,4,A_pad)

    # _get_top_n_idx: per-level top-k on raw objectness (pre-sigmoid; monotonic)
    top_idx = []
    offset = 0
    for n_lvl in num_anchors_per_level:
        k_lvl = min(pre_nms_top_n, n_lvl)
        _, idx = lax.top_k(obj[:, offset:offset + n_lvl], k_lvl)
        top_idx.append(idx + offset)
        offset += n_lvl
    top_idx = jnp.concatenate(top_idx, axis=1)                  # (N, K0)
    k0 = top_idx.shape[1]

    levels_all = jnp.concatenate(
        [jnp.full((n_lvl,), i, jnp.float32)
         for i, n_lvl in enumerate(num_anchors_per_level)])

    cand_boxes = jnp.take_along_axis(boxes_soa, top_idx[:, None, :], axis=2)  # (N,4,K0)
    cand_obj = jnp.take_along_axis(obj, top_idx, axis=1)                      # (N,K0)
    cand_scores = jax.nn.sigmoid(cand_obj)
    cand_lvls = levels_all[top_idx]                                           # (N,K0)

    # pad candidate count to a lane-dense multiple of 128 for the NMS kernel
    k_pad = ((k0 + 127) // 128) * 128
    pad = k_pad - k0
    if pad:
        cand_boxes = jnp.pad(cand_boxes, ((0, 0), (0, 0), (0, pad)))
        cand_scores = jnp.pad(cand_scores, ((0, 0), (0, pad)))
        cand_lvls = jnp.pad(cand_lvls, ((0, 0), (0, pad)))

    ws = cand_boxes[:, 2, :] - cand_boxes[:, 0, :]
    hs = cand_boxes[:, 3, :] - cand_boxes[:, 1, :]
    valid = jnp.arange(k_pad)[None, :] < k0
    valid = valid & (ws >= min_size) & (hs >= min_size)          # remove_small_boxes
    valid = valid & (cand_scores >= score_thresh)                # score threshold
    nms_scores = jnp.where(valid, cand_scores, NEG_INF)

    # batched_nms (per-level) fused with the greedy selection loop (Pallas kernel 2)
    keep_idx, keep_score = nms_fused(cand_boxes, nms_scores, cand_lvls,
                                     post_n=post_nms_top_n, iou_thresh=nms_thresh)

    keep_valid = keep_score > VALID_CUTOFF
    final_boxes = jnp.take_along_axis(cand_boxes, keep_idx[:, None, :], axis=2)  # (N,4,P)
    final_boxes = jnp.transpose(final_boxes, (0, 2, 1))                          # (N,P,4)
    final_boxes = jnp.where(keep_valid[:, :, None], final_boxes, 0.0)
    final_scores = jnp.where(keep_valid, keep_score, 0.0)

    return {'boxes': final_boxes, 'scores': final_scores,
            'valid': keep_valid, 'priors': None}


# ----------------------------------------------------------------------------
# Deterministic example setup
# ----------------------------------------------------------------------------
def make_anchors_soa(levels_spec, img_size, num_images):
    """Synthetic anchor grid in coord-major SoA layout (N, 4, A_total);
    per-level ordering (H, W, A) to match permute_and_flatten."""
    per_level = []
    for li, (a, h, w) in enumerate(levels_spec):
        stride = img_size / h
        sizes = jnp.array([8.0 * (2 ** li) * (1.5 ** s) for s in range(a)],
                          jnp.float32)                          # (A,)
        ys = (jnp.arange(h, dtype=jnp.float32) + 0.5) * stride
        xs = (jnp.arange(w, dtype=jnp.float32) + 0.5) * stride
        cy, cx = jnp.meshgrid(ys, xs, indexing='ij')            # (H, W)
        cy = cy[:, :, None]
        cx = cx[:, :, None]
        half = sizes[None, None, :] / 2.0
        anch = jnp.stack([cx - half, cy - half, cx + half, cy + half],
                         axis=0).reshape(4, -1)                 # (4, H*W*A)
        per_level.append(anch)
    anchors = jnp.concatenate(per_level, axis=1)                # (4, A_total)
    return jnp.broadcast_to(anchors[None], (num_images,) + anchors.shape)


if __name__ == "__main__":
    key = jax.random.PRNGKey(0)
    num_images = 2
    levels_spec = [(3, 8, 8), (3, 4, 4)]   # (A, H, W) per FPN level
    img_size = 64

    objectness_list, deltas_list = [], []
    for (a, h, w) in levels_spec:
        key, k1, k2 = jax.random.split(key, 3)
        objectness_list.append(
            jax.random.normal(k1, (num_images, a, h, w), jnp.float32))
        deltas_list.append(
            0.5 * jax.random.normal(k2, (num_images, 4 * a, h, w), jnp.float32))

    anchors_soa = make_anchors_soa(levels_spec, img_size, num_images)  # (2, 4, 240)
    image_sizes_hw = jnp.array([[64.0, 64.0], [60.0, 56.0]], jnp.float32)

    out = rpn_predictor_forward(
        objectness_list, deltas_list, anchors_soa, image_sizes_hw,
        pre_nms_top_n=64,        # {'testing': 64}
        post_nms_top_n=32,       # {'testing': 32}
        nms_thresh=0.7,
        score_thresh=0.0,
        min_size=0.001,
    )

    jax.block_until_ready((out['boxes'], out['scores'], out['valid']))
    print("KERNEL_OK")
</pallas_src>

<mosaic_0001>
module attributes {stable_mosaic.version = 11 : i64} {
  func.func @_decode_clip_kernel(%arg0: i32, %arg1: i32, %arg2: memref<2x2xf32, #tpu.memory_space<smem>>, %arg3: memref<1x4x2x128xf32, #tpu.memory_space<vmem>>, %arg4: memref<1x4x2x128xf32, #tpu.memory_space<vmem>>, %arg5: memref<1x4x2x128xf32, #tpu.memory_space<vmem>>) attributes {dimension_semantics = [#tpu.dimension_semantics<parallel>, #tpu.dimension_semantics<parallel>], iteration_bounds = array<i64: 2, 1>, scalar_prefetch = 0 : i64, scratch_operands = 0 : i64, tpu.core_type = #tpu.core_type<tc>, window_params = [{transform_indices = @transform_0, window_bounds = array<i64: 2, 2>}, {transform_indices = @transform_1, window_bounds = array<i64: 1, 4, 2, 128>}, {transform_indices = @transform_2, window_bounds = array<i64: 1, 4, 2, 128>}, {transform_indices = @transform_3, window_bounds = array<i64: 1, 4, 2, 128>}]} {
    %0 = arith.index_cast %arg0 : i32 to index
    %c0 = arith.constant 0 : index
    %1 = memref.load %arg2[%0, %c0] : memref<2x2xf32, #tpu.memory_space<smem>>
    %2 = arith.index_cast %arg0 : i32 to index
    %c1 = arith.constant 1 : index
    %3 = memref.load %arg2[%2, %c1] : memref<2x2xf32, #tpu.memory_space<smem>>
    %c0_0 = arith.constant 0 : index
    %c0_1 = arith.constant 0 : index
    %c0_2 = arith.constant 0 : index
    %c0_3 = arith.constant 0 : index
    %4 = vector.load %arg3[%c0_0, %c0_1, %c0_2, %c0_3] : memref<1x4x2x128xf32, #tpu.memory_space<vmem>>, vector<1x1x2x128xf32>
    %5 = vector.shape_cast %4 : vector<1x1x2x128xf32> to vector<2x128xf32>
    %c0_4 = arith.constant 0 : index
    %c1_5 = arith.constant 1 : index
    %c0_6 = arith.constant 0 : index
    %c0_7 = arith.constant 0 : index
    %6 = vector.load %arg3[%c0_4, %c1_5, %c0_6, %c0_7] : memref<1x4x2x128xf32, #tpu.memory_space<vmem>>, vector<1x1x2x128xf32>
    %7 = vector.shape_cast %6 : vector<1x1x2x128xf32> to vector<2x128xf32>
    %c0_8 = arith.constant 0 : index
    %c2 = arith.constant 2 : index
    %c0_9 = arith.constant 0 : index
    %c0_10 = arith.constant 0 : index
    %8 = vector.load %arg3[%c0_8, %c2, %c0_9, %c0_10] : memref<1x4x2x128xf32, #tpu.memory_space<vmem>>, vector<1x1x2x128xf32>
    %9 = vector.shape_cast %8 : vector<1x1x2x128xf32> to vector<2x128xf32>
    %c0_11 = arith.constant 0 : index
    %c3 = arith.constant 3 : index
    %c0_12 = arith.constant 0 : index
    %c0_13 = arith.constant 0 : index
    %10 = vector.load %arg3[%c0_11, %c3, %c0_12, %c0_13] : memref<1x4x2x128xf32, #tpu.memory_space<vmem>>, vector<1x1x2x128xf32>
    %11 = vector.shape_cast %10 : vector<1x1x2x128xf32> to vector<2x128xf32>
    %12 = arith.subf %9, %5 : vector<2x128xf32>
    %13 = arith.subf %11, %7 : vector<2x128xf32>
    %cst = arith.constant 5.000000e-01 : f32
    %14 = vector.broadcast %cst : f32 to vector<2x128xf32>
    %15 = arith.mulf %14, %12 : vector<2x128xf32>
    %16 = arith.addf %5, %15 : vector<2x128xf32>
    %cst_14 = arith.constant 5.000000e-01 : f32
    %17 = vector.broadcast %cst_14 : f32 to vector<2x128xf32>
    %18 = arith.mulf %17, %13 : vector<2x128xf32>
    %19 = arith.addf %7, %18 : vector<2x128xf32>
    %c0_15 = arith.constant 0 : index
    %c0_16 = arith.constant 0 : index
    %c0_17 = arith.constant 0 : index
    %c0_18 = arith.constant 0 : index
    %20 = vector.load %arg4[%c0_15, %c0_16, %c0_17, %c0_18] : memref<1x4x2x128xf32, #tpu.memory_space<vmem>>, vector<1x1x2x128xf32>
    %21 = vector.shape_cast %20 : vector<1x1x2x128xf32> to vector<2x128xf32>
    %cst_19 = arith.constant 1.000000e+00 : f32
    %22 = vector.broadcast %cst_19 : f32 to vector<2x128xf32>
    %23 = arith.divf %21, %22 : vector<2x128xf32>
    %c0_20 = arith.constant 0 : index
    %c1_21 = arith.constant 1 : index
    %c0_22 = arith.constant 0 : index
    %c0_23 = arith.constant 0 : index
    %24 = vector.load %arg4[%c0_20, %c1_21, %c0_22, %c0_23] : memref<1x4x2x128xf32, #tpu.memory_space<vmem>>, vector<1x1x2x128xf32>
    %25 = vector.shape_cast %24 : vector<1x1x2x128xf32> to vector<2x128xf32>
    %cst_24 = arith.constant 1.000000e+00 : f32
    %26 = vector.broadcast %cst_24 : f32 to vector<2x128xf32>
    %27 = arith.divf %25, %26 : vector<2x128xf32>
    %c0_25 = arith.constant 0 : index
    %c2_26 = arith.constant 2 : index
    %c0_27 = arith.constant 0 : index
    %c0_28 = arith.constant 0 : index
    %28 = vector.load %arg4[%c0_25, %c2_26, %c0_27, %c0_28] : memref<1x4x2x128xf32, #tpu.memory_space<vmem>>, vector<1x1x2x128xf32>
    %29 = vector.shape_cast %28 : vector<1x1x2x128xf32> to vector<2x128xf32>
    %cst_29 = arith.constant 1.000000e+00 : f32
    %30 = vector.broadcast %cst_29 : f32 to vector<2x128xf32>
    %31 = arith.divf %29, %30 : vector<2x128xf32>
    %cst_30 = arith.constant 4.13516665 : f32
    %32 = vector.broadcast %cst_30 : f32 to vector<2x128xf32>
    %33 = arith.minimumf %31, %32 : vector<2x128xf32>
    %c0_31 = arith.constant 0 : index
    %c3_32 = arith.constant 3 : index
    %c0_33 = arith.constant 0 : index
    %c0_34 = arith.constant 0 : index
    %34 = vector.load %arg4[%c0_31, %c3_32, %c0_33, %c0_34] : memref<1x4x2x128xf32, #tpu.memory_space<vmem>>, vector<1x1x2x128xf32>
    %35 = vector.shape_cast %34 : vector<1x1x2x128xf32> to vector<2x128xf32>
    %cst_35 = arith.constant 1.000000e+00 : f32
    %36 = vector.broadcast %cst_35 : f32 to vector<2x128xf32>
    %37 = arith.divf %35, %36 : vector<2x128xf32>
    %cst_36 = arith.constant 4.13516665 : f32
    %38 = vector.broadcast %cst_36 : f32 to vector<2x128xf32>
    %39 = arith.minimumf %37, %38 : vector<2x128xf32>
    %40 = arith.mulf %23, %12 : vector<2x128xf32>
    %41 = arith.addf %40, %16 : vector<2x128xf32>
    %42 = arith.mulf %27, %13 : vector<2x128xf32>
    %43 = arith.addf %42, %19 : vector<2x128xf32>
    %44 = math.exp %33 : vector<2x128xf32>
    %45 = arith.mulf %44, %12 : vector<2x128xf32>
    %46 = math.exp %39 : vector<2x128xf32>
    %47 = arith.mulf %46, %13 : vector<2x128xf32>
    %cst_37 = arith.constant 5.000000e-01 : f32
    %48 = vector.broadcast %cst_37 : f32 to vector<2x128xf32>
    %49 = arith.mulf %48, %45 : vector<2x128xf32>
    %50 = arith.subf %41, %49 : vector<2x128xf32>
    %cst_38 = arith.constant 0.000000e+00 : f32
    %51 = vector.broadcast %cst_38 : f32 to vector<2x128xf32>
    %52 = arith.maximumf %51, %50 : vector<2x128xf32>
    %53 = vector.broadcast %3 : f32 to vector<2x128xf32>
    %54 = arith.minimumf %53, %52 : vector<2x128xf32>
    %c0_39 = arith.constant 0 : index
    %c0_40 = arith.constant 0 : index
    %c0_41 = arith.constant 0 : index
    %c0_42 = arith.constant 0 : index
    %55 = vector.load %arg5[%c0_39, %c0_40, %c0_41, %c0_42] : memref<1x4x2x128xf32, #tpu.memory_space<vmem>>, vector<1x1x2x128xf32>
    %56 = vector.shape_cast %55 : vector<1x1x2x128xf32> to vector<2x128xf32>
    %57 = vector.shape_cast %54 : vector<2x128xf32> to vector<1x1x2x128xf32>
    tpu.vector_store %arg5[%c0_39, %c0_40, %c0_41, %c0_42], %57 {strides = array<i32>} : memref<1x4x2x128xf32, #tpu.memory_space<vmem>>, vector<1x1x2x128xf32>,
    %cst_43 = arith.constant 5.000000e-01 : f32
    %58 = vector.broadcast %cst_43 : f32 to vector<2x128xf32>
    %59 = arith.mulf %58, %47 : vector<2x128xf32>
    %60 = arith.subf %43, %59 : vector<2x128xf32>
    %cst_44 = arith.constant 0.000000e+00 : f32
    %61 = vector.broadcast %cst_44 : f32 to vector<2x128xf32>
    %62 = arith.maximumf %61, %60 : vector<2x128xf32>
    %63 = vector.broadcast %1 : f32 to vector<2x128xf32>
    %64 = arith.minimumf %63, %62 : vector<2x128xf32>
    %c0_45 = arith.constant 0 : index
    %c1_46 = arith.constant 1 : index
    %c0_47 = arith.constant 0 : index
    %c0_48 = arith.constant 0 : index
    %65 = vector.load %arg5[%c0_45, %c1_46, %c0_47, %c0_48] : memref<1x4x2x128xf32, #tpu.memory_space<vmem>>, vector<1x1x2x128xf32>
    %66 = vector.shape_cast %65 : vector<1x1x2x128xf32> to vector<2x128xf32>
    %67 = vector.shape_cast %64 : vector<2x128xf32> to vector<1x1x2x128xf32>
    tpu.vector_store %arg5[%c0_45, %c1_46, %c0_47, %c0_48], %67 {strides = array<i32>} : memref<1x4x2x128xf32, #tpu.memory_space<vmem>>, vector<1x1x2x128xf32>,
    %cst_49 = arith.constant 5.000000e-01 : f32
    %68 = vector.broadcast %cst_49 : f32 to vector<2x128xf32>
    %69 = arith.mulf %68, %45 : vector<2x128xf32>
    %70 = arith.addf %41, %69 : vector<2x128xf32>
    %cst_50 = arith.constant 0.000000e+00 : f32
    %71 = vector.broadcast %cst_50 : f32 to vector<2x128xf32>
    %72 = arith.maximumf %71, %70 : vector<2x128xf32>
    %73 = vector.broadcast %3 : f32 to vector<2x128xf32>
    %74 = arith.minimumf %73, %72 : vector<2x128xf32>
    %c0_51 = arith.constant 0 : index
    %c2_52 = arith.constant 2 : index
    %c0_53 = arith.constant 0 : index
    %c0_54 = arith.constant 0 : index
    %75 = vector.load %arg5[%c0_51, %c2_52, %c0_53, %c0_54] : memref<1x4x2x128xf32, #tpu.memory_space<vmem>>, vector<1x1x2x128xf32>
    %76 = vector.shape_cast %75 : vector<1x1x2x128xf32> to vector<2x128xf32>
    %77 = vector.shape_cast %74 : vector<2x128xf32> to vector<1x1x2x128xf32>
    tpu.vector_store %arg5[%c0_51, %c2_52, %c0_53, %c0_54], %77 {strides = array<i32>} : memref<1x4x2x128xf32, #tpu.memory_space<vmem>>, vector<1x1x2x128xf32>,
    %cst_55 = arith.constant 5.000000e-01 : f32
    %78 = vector.broadcast %cst_55 : f32 to vector<2x128xf32>
    %79 = arith.mulf %78, %47 : vector<2x128xf32>
    %80 = arith.addf %43, %79 : vector<2x128xf32>
    %cst_56 = arith.constant 0.000000e+00 : f32
    %81 = vector.broadcast %cst_56 : f32 to vector<2x128xf32>
    %82 = arith.maximumf %81, %80 : vector<2x128xf32>
    %83 = vector.broadcast %1 : f32 to vector<2x128xf32>
    %84 = arith.minimumf %83, %82 : vector<2x128xf32>
    %c0_57 = arith.constant 0 : index
    %c3_58 = arith.constant 3 : index
    %c0_59 = arith.constant 0 : index
    %c0_60 = arith.constant 0 : index
    %85 = vector.load %arg5[%c0_57, %c3_58, %c0_59, %c0_60] : memref<1x4x2x128xf32, #tpu.memory_space<vmem>>, vector<1x1x2x128xf32>
    %86 = vector.shape_cast %85 : vector<1x1x2x128xf32> to vector<2x128xf32>
    %87 = vector.shape_cast %84 : vector<2x128xf32> to vector<1x1x2x128xf32>
    tpu.vector_store %arg5[%c0_57, %c3_58, %c0_59, %c0_60], %87 {strides = array<i32>} : memref<1x4x2x128xf32, #tpu.memory_space<vmem>>, vector<1x1x2x128xf32>,
    return
  }
  func.func @transform_0(%arg0: i32, %arg1: i32) -> (i32, i32) {
    %c0_i32 = arith.constant 0 : i32
    %c0_i32_0 = arith.constant 0 : i32
    %c0_i32_1 = arith.constant 0 : i32
    return %c0_i32, %c0_i32_0 : i32, i32
  }
  func.func @transform_1(%arg0: i32, %arg1: i32) -> (i32, i32, i32, i32) {
    %c0_i32 = arith.constant 0 : i32
    %c0_i32_0 = arith.constant 0 : i32
    %c0_i32_1 = arith.constant 0 : i32
    return %arg0, %c0_i32, %arg1, %c0_i32_0 : i32, i32, i32, i32
  }
  func.func @transform_2(%arg0: i32, %arg1: i32) -> (i32, i32, i32, i32) {
    %c0_i32 = arith.constant 0 : i32
    %c0_i32_0 = arith.constant 0 : i32
    %c0_i32_1 = arith.constant 0 : i32
    return %arg0, %c0_i32, %arg1, %c0_i32_0 : i32, i32, i32, i32
  }
  func.func @transform_3(%arg0: i32, %arg1: i32) -> (i32, i32, i32, i32) {
    %c0_i32 = arith.constant 0 : i32
    %c0_i32_0 = arith.constant 0 : i32
    %c0_i32_1 = arith.constant 0 : i32
    return %arg0, %c0_i32, %arg1, %c0_i32_0 : i32, i32, i32, i32
  }
}

</mosaic_0001>

<bundles_post_ra>
// kernel: tpu_custom_call.1
= control target key start
LH: loop header
LB: loop body
LE: loop exit
PB: predicated region body
PF: predicated region fallthrough
CT: control target
= control target key end

     0   :  { %s964_s0 = inlined_call_operand.hbm [shape: f32[2,2], index: 0, kind: input, shape index: {}]   ;;  %s965_s1 = inlined_call_operand.hbm [shape: f32[2,4,2,128], index: 1, kind: input, shape index: {}]   ;;  %s966_s2 = inlined_call_operand.hbm [shape: f32[2,4,2,128], index: 2, kind: input, shape index: {}]   ;;  %s967_s3 = inlined_call_operand.hbm [shape: f32[2,4,2,128], index: 3, kind: output, shape index: {}]  }
   0x1   :  { %970 = sst [smem:[#allocation16_spill]] %s964_s0 }
   0x2   :  { %971 = sst [smem:[#allocation17_spill]] %s965_s1 }
   0x3   :  { %8 = vsyncpa [#allocation5], 0 }
   0x4   :  { %9 = vsyncpa [#allocation3], 0 }
   0x5   :  { %11 = vsyncpa [#allocation3 + $0x1], 0 }
   0x6   :  { %12 = vsyncpa [#allocation8], 0 }
   0x7   :  { %14 = vsyncpa [#allocation8 + $0x1], 0 }
   0x8   :  { %15 = vsyncpa [#allocation4], 0 }
   0x9   :  { %17 = vsyncpa [#allocation4 + $0x1], 0  ;;  %s762_s12 = smov 0   ;;  %s764_s13 = smov 0  }
   0xa   :  { %s766_s14 = smov 0   ;;  %s768_s15 = smov 0  }
   0xb   :  { %s770_s16 = smov 0   ;;  %s772_s17 = smov 0  }
   0xc LB: > { %s457_s18 = sadd.s32 4294967295, %s732_s17   ;;  %s458_s19 = sadd.s32 4294967294, %s732_s17   ;;  %s732_s17 = sphi %s772_s17, %s23_s17   ;;  %s728_s16 = sphi %s770_s16, %s991_s16   ;;  %s724_s15 = sphi %s768_s15, %s990_s15   ;;  %s720_s14 = sphi %s766_s14, %s989_s14   ;;  %s716_s13 = sphi %s764_s13, %s988_s13   ;;  %s712_s12 = sphi %s762_s12, %s987_s12  }
   0xd   : > { %s65_s20 = sadd.s32 1, %s720_s14  ;;  %p72_p0 = scmp.ne.s32.totalorder %s720_s14, %s716_s13 }
   0xe   : > { %p73_p1 = scmp.eq.s32.totalorder %s732_s17, 0  ;;  %p78_p2 = scmp.ne.s32.totalorder %s716_s13, %s712_s12 }
   0xf   : > { %p800_p3 = scmp.eq.s32.totalorder %s457_s18, 0  ;;  %p132_p4 = scmp.eq.s32.totalorder %s457_s18, 1 }
  0x10   : > { %p74_p5 = por %p73_p1, %p72_p0  ;;  %p138_p6 = scmp.eq.s32.totalorder %s458_s19, 1 }
  0x11   : > { %p806_p7 = por %p800_p3, %p78_p2  ;;  %p810_p8 = por %p132_p4, %p72_p0 }
  0x12   : > { %p814_p9 = por %p138_p6, %p78_p2  ;;  %p459_p10 = scmp.ge.s32.totalorder %s732_s17, 1 }
  0x13   : > { %p145_p11 = scmp.lt.s32.totalorder %s732_s17, 3  ;;  %p517_p1 = scmp.lt.s32.totalorder %s732_s17, 2 }
  0x14   : > { %s975_s24 = scalar_select %p814_p9, 1, 0 }
  0x15   : > { %p821_p13 = pnand %p459_p10, %p145_p11  ;;  %s827_s26 = sand.u32 1, %s720_s14  }
  0x16   : > { %p831_p2 = pnand %p517_p1, %p74_p5  ;;  %s35_s28 = sadd.s32 1, %s728_s16 }
  0x17   : > { %p501_p0 = pneg %p821_p13  ;;  %s968_s29 = sshll.u32 %s827_s26, 3 }
  0x18   : > { %p37_p6 = scmp.ge.s32.totalorder %s35_s28, 2  ;;  %s734_s30 = smov [#allocation2]  }
  0x19   : > { %p502_p4 = pnand %p501_p0, %p800_p3  ;;  %s978_s0 = sld [smem:[#allocation16_spill]] }
  0x1a   : > { %s993_s28 = smov (%p37_p6, %s35_s28), 0  ;;  %s488_s6 = sshll.u32 %s728_s16, 7 }
  0x1b   : > { %979 = sst [smem:[#allocation14_spill]] %s993_s28  ;;  %s60_s7 = ssub.s32 %s728_s16, %s993_s28 }
  0x1c   : > { %s980_s1 = sld [smem:[#allocation17_spill]]  ;;  %p63_p5 = scmp.eq.s32.totalorder %s60_s7, 0 }
  0x1d   : > { %s171_s11 = scalar_lea.vmem [#allocation6], %s968_s29  ;;  %s168_s4 = scalar_lea.sflag [#allocation3], %s827_s26 }
  0x1e   : > { %s179_s18 = sshll.u32 %s171_s11, 4  ;;  %p590_p10 = pneg %p831_p2  ;;  %s180_s18 = int_to_ptr.vmem [resolvable:$true] %s179_s18 }
  0x1f   : > { %504 = dma.hbm_to_smem (!%p502_p4), %s978_s0, 32, %s734_s30, [#allocation5]  }
  0x20   : > { %s857_s19 = scalar_select %p63_p5, %s720_s14, %s65_s20  }
  0x21   : > { %s601_s30 = scalar_lea.vmem %s180_s18, 128  ;;  %s735_s5 = smov [#allocation6]  }
  0x22   : > { %s178_s10 = scalar_lea.hbm %s980_s1, %s488_s6  ;;  %981 = sst [smem:[#allocation15_spill]] %s857_s19 }
  0x23   : > { %p602_p11 = scmp.ne.s32.totalorder %s180_s18, %s601_s30  ;;  %s606_s8 = sshll.u32 %s735_s5, 4  ;;  %s607_s8 = int_to_ptr.vmem [resolvable:$false] %s606_s8 }
  0x24   : > { %s608_s7 = scalar_lea.vmem %s607_s8, 256  ;;  %p609_p4 = scmp.lt.s32.totalorder %s180_s18, %s607_s8 }
  0x25   : > { %p604_p1 = pnand %p602_p11, %p590_p10  ;;  %p610_p6 = scmp.lt.s32.totalorder %s608_s7, %s601_s30 }
  0x27   : > { %p605_p0 = pneg %p604_p1  ;;  %p611_p12 = por %p610_p6, %p609_p4 }
  0x29   : > { %p612_p9 = pnand %p611_p12, %p605_p0 }
  0x2b   : > { %615 = shalt.err (!%p612_p9)
}
  0x2c   : > { %s736_s20 = smov 32   ;;  %s737_s9 = smov 2  }
  0x2d   : > { %508 = dma.hbm_to_vmem [thread:$0]  (!%p831_p2), %s178_s10, 128, %s180_s18, %s168_s4, %s736_s20, %s736_s20, %s737_s9  }
  0x2e   : > { %s200_s5 = scalar_lea.hbm %s966_s2, %s488_s6  ;;  %s982_s0 = sshll.u32 %s827_s26, 3 }
  0x2f   : > { %s193_s8 = scalar_lea.vmem [#allocation7], %s982_s0  ;;  %s190_s7 = scalar_lea.sflag [#allocation8], %s827_s26 }
  0x30   : > { %s201_s30 = sshll.u32 %s193_s8, 4  ;;  %s738_s28 = smov [#allocation7]   ;;  %s202_s30 = int_to_ptr.vmem [resolvable:$true] %s201_s30 }
  0x31   : > { %s629_s1 = scalar_lea.vmem %s202_s30, 128  ;;  %s634_s19 = sshll.u32 %s738_s28, 4  ;;  %s635_s19 = int_to_ptr.vmem [resolvable:$false] %s634_s19 }
  0x32   : > { %p630_p9 = scmp.ne.s32.totalorder %s202_s30, %s629_s1  ;;  %s636_s10 = scalar_lea.vmem %s635_s19, 256 }
  0x33   : > { %p637_p11 = scmp.lt.s32.totalorder %s202_s30, %s635_s19  ;;  %p638_p1 = scmp.lt.s32.totalorder %s636_s10, %s629_s1 }
  0x34   : > { %p632_p12 = pnand %p630_p9, %p590_p10 }
  0x35   : > { %p639_p0 = por %p638_p1, %p637_p11 }
  0x36   : > { %p633_p5 = pneg %p632_p12 }
  0x38   : > { %p640_p4 = pnand %p639_p0, %p633_p5 }
  0x3a   : > { %643 = shalt.err (!%p640_p4)
}
  0x3b   : > { %511 = dma.hbm_to_vmem [thread:$0]  (!%p831_p2), %s200_s5, 128, %s202_s30, %s190_s7, %s736_s20, %s736_s20, %s737_s9  }
  0x3c   : > { %213 = sbr.rel (%p821_p13) target bundleno = 118 (0x76), region = 32 }
  0x41   : > { %695 = dma.done.wait (%p800_p3), [#allocation5], 32  }
  0x42   : > { %697 = vsyncadd (%p800_p3), [#allocation5], 4294967264  ;;  %s887_s0 = sand.u32 1, %s716_s13  }
  0x43   : > { %s890_s1 = sshll.u32 %s887_s0, 3  ;;  %s220_s26 = scalar_lea.sflag [#allocation3], %s887_s0 }
  0x44   : > { %s223_s27 = scalar_lea.vmem [#allocation6], %s890_s1 }
  0x45   : > { %699 = dma.done.wait (%p806_p7), %s220_s26, 128  }
  0x46   : > { %701 = vsyncadd (%p806_p7), %s220_s26, 4294967168  ;;  %s229_s21 = scalar_lea.sflag [#allocation8], %s887_s0  ;;  %s232_s25 = scalar_lea.vmem [#allocation7], %s890_s1 }
  0x47   : > { %703 = dma.done.wait (%p806_p7), %s229_s21, 128  }
  0x48   : > { %705 = vsyncadd (%p806_p7), %s229_s21, 4294967168 }
  0x49   : > { %237 = sfence }
  0x4a   : > { %v478_v0 = vld [vmem:[%s232_s25 + $0x4] sm:$0x3]  ;;  %v479_v3 = vld [vmem:[%s232_s25 + $0x6] sm:$0x3]  ;;  %v265_v4 = vld [vmem:[%s223_s27] sm:$0x3] }
  0x4b   : > { %v283_v1 = vmin.f32 %v478_v0, 4.1351666  ;;  %v475_v5 = vld [vmem:[%s223_s27 + $0x4] sm:$0x3]  ;;  %v286_v6 = vmin.f32 %v479_v3, 4.1351666 }
  0x4c   : > { %v272_v8 = vsub.f32 %v475_v5, %v265_v4  ;;  %v474_v9 = vld [vmem:[%s223_s27 + $0x2] sm:$0x3]  ;;  %v476_v10 = vld [vmem:[%s223_s27 + $0x6] sm:$0x3]  ;;  %s905_s28 = sshll.u32 %s724_s15, 7  ;;  %s260_s15 = scalar_lea.vmem [#allocation9], %s890_s1 }
  0x4d   : > { %v291_v2 = vmul.f32 1.442695, %v283_v1  ;;  %v294_v7 = vmul.f32 1.442695, %v286_v6  ;;  %v273_v11 = vsub.f32 %v476_v10, %v474_v9  ;;  %v278_v13 = vld [vmem:[%s232_s25] sm:$0x3]  ;;  %s914_s20 = scalar_lea.hbm %s967_s3, %s905_s28 }
  0x4e   : > { %v274_v12 = vmul.f32 0.5, %v272_v8  ;;  %s263_s22 = sadd.s32 1, %s905_s28  ;;  %v287_v16 = vmul.f32 %v278_v13, %v272_v8  ;;  %v477_v17 = vld [vmem:[%s232_s25 + $0x2] sm:$0x3]  ;;  %s262_s6 = sld [smem:[#allocation2 + %s905_s28]] }
  0x4f   : > { %573 = vpow2.f32 %v291_v2  ;;  %v276_v14 = vmul.f32 0.5, %v273_v11  ;;  %s264_s29 = sld [smem:[#allocation2 + %s263_s22]]  ;;  %v289_v20 = vmul.f32 %v477_v17, %v273_v11  ;;  %s335_s18 = sshll.u32 %s260_s15, 4  ;;  %s916_s18 = int_to_ptr.vmem [resolvable:$true] %s335_s18 }
  0x50   : > { %575 = vpow2.f32 %v294_v7  ;;  %v275_v15 = vadd.f32 %v274_v12, %v265_v4  ;;  %s321_s9 = scalar_lea.sflag [#allocation4], %s887_s0  ;;  %s644_s11 = scalar_lea.vmem %s916_s18, 128 }
  0x51   : > { %v277_v19 = vadd.f32 %v474_v9, %v276_v14  ;;  %p645_p3 = scmp.ne.s32.totalorder %s916_s18, %s644_s11  ;;  %s739_s5 = smov [#allocation9]  }
  0x52   : > { %v288_v21 = vadd.f32 %v287_v16, %v275_v15  ;;  %s648_s8 = sshll.u32 %s739_s5, 4  ;;  %s649_s8 = int_to_ptr.vmem [resolvable:$false] %s648_s8 }
  0x53   : > { %v290_v25 = vadd.f32 %v289_v20, %v277_v19  ;;  %p646_p7 = pnand %p645_p3, %p810_p8  ;;  %s650_s30 = scalar_lea.vmem %s649_s8, 256 }
  0x54   : > { %v306_v36 = vstv %s262_s6  ;;  %p651_p2 = scmp.lt.s32.totalorder %s916_s18, %s649_s8  ;;  %p652_p10 = scmp.lt.s32.totalorder %s650_s30, %s644_s11 }
  0x55   : > { %v300_v29 = vstv %s264_s29  ;;  %p647_p13 = pneg %p646_p7 }
  0x56   : > { %p653_p6 = por %p652_p10, %p651_p2 }
  0x58   : > { %p654_p9 = pnand %p653_p6, %p647_p13 }
  0x5c   : > { %v574_v18 = vpop.eup %573 }
  0x5d   : > { %v293_v22 = vmul.f32 %v574_v18, %v272_v8  ;;  %v576_v23 = vpop.eup %575 }
  0x5e   : > { %v296_v26 = vmul.f32 %v576_v23, %v273_v11 }
  0x5f   : > { %v297_v24 = vmul.f32 0.5, %v293_v22 }
  0x60   : > { %v303_v30 = vmul.f32 0.5, %v296_v26 }
  0x61   : > { %v298_v27 = vsub.f32 %v288_v21, %v297_v24  ;;  %v310_v28 = vadd.f32 %v297_v24, %v288_v21 }
  0x62   : > { %v304_v33 = vsub.f32 %v290_v25, %v303_v30  ;;  %v315_v34 = vadd.f32 %v303_v30, %v290_v25 }
  0x63   : > { %v299_v31 = vmax.f32 %v298_v27, 0.0  ;;  %v311_v32 = vmax.f32 %v310_v28, 0.0 }
  0x64   : > { %v305_v38 = vmax.f32 %v304_v33, 0.0  ;;  %v316_v39 = vmax.f32 %v315_v34, 0.0 }
  0x65   : > { %v301_v35 = vmin.f32 %v300_v29, %v299_v31  ;;  %v312_v37 = vmin.f32 %v300_v29, %v311_v32 }
  0x66   : > { %v307_v40 = vmin.f32 %v306_v36, %v305_v38  ;;  %v317_v41 = vmin.f32 %v306_v36, %v316_v39 }
  0x67   : > { %302 = vst [vmem:[%s260_s15] sm:$0x3] %v301_v35  ;;  %481 = vst [vmem:[%s260_s15 + $0x4] sm:$0x3] %v312_v37 }
  0x68   : > { %480 = vst [vmem:[%s260_s15 + $0x2] sm:$0x3] %v307_v40  ;;  %482 = vst [vmem:[%s260_s15 + $0x6] sm:$0x3] %v317_v41 }
  0x69   : > { %657 = shalt.err (!%p654_p9)
}
  0x6a   : > { %s658_s7 = scalar_lea.hbm %s914_s20, 128  ;;  %s662_s26 = scalar_lea.hbm %s967_s3, 256 }
  0x6b   : > { %p659_p12 = scmp.ne.s32.totalorder %s914_s20, %s658_s7  ;;  %p663_p1 = scmp.lt.s32.totalorder %s914_s20, %s967_s3 }
  0x6c   : > { %p664_p0 = scmp.lt.s32.totalorder %s662_s26, %s658_s7 }
  0x6d   : > { %p660_p5 = pnand %p659_p12, %p810_p8 }
  0x6e   : > { %p665_p4 = por %p664_p0, %p663_p1 }
  0x6f   : > { %p661_p11 = pneg %p660_p5 }
  0x71   : > { %p666_p3 = pnand %p665_p4, %p661_p11 }
  0x73   : > { %669 = shalt.err (!%p666_p3)
}
  0x74   : > { %s740_s25 = smov 32   ;;  %s741_s28 = smov 2  }
  0x75   : > { %499 = dma.vmem_to_hbm [thread:$0]  (%p810_p8), %s916_s18, 128, %s914_s20, %s321_s9, %s740_s25, %s740_s25, %s741_s28  }
  0x76 PF: > { %s350_s22 = sand.u32 1, %s712_s12   ;;  %p983_p7 = scmp.ne.s32.totalorder %s975_s24, 0 }
  0x77   : > { %p984_p13 = scmp.ge.s32.totalorder %s732_s17, 2  ;;  %s351_s29 = scalar_lea.sflag [#allocation4], %s350_s22 }
  0x79   : > { %p513_p2 = pnand %p984_p13, %p983_p7 }
  0x7b   : > { %p514_p10 = pneg %p513_p2 }
  0x7d   : > { %707 = dma.done.wait (%p514_p10), %s351_s29, 128  }
  0x7e   : > { %709 = vsyncadd (%p514_p10), %s351_s29, 4294967168  ;;  %s23_s17 = sadd.s32 1, %s732_s17   ;;  %s985_s23 = sld [smem:[#allocation15_spill]] }
  0x7f   : > { %p20_p6 = scmp.ge.s32.totalorder %s23_s17, 4   ;;  %s986_s0 = sld [smem:[#allocation14_spill]] }
  0x80   : > { %s987_s12 = smov %s716_s13  ;;  %s988_s13 = smov %s720_s14 }
  0x81   : > { %s990_s15 = smov %s728_s16  ;;  %22 = sbr.rel (!%p20_p6) target bundleno = 12 (0xc), region = 104 }
  0x84   : > { %s989_s14 = smov %s985_s23 }
  0x85   : > { %s991_s16 = smov %s986_s0 }
  0x86   :  { %356 = vsyncpa [#allocation3], 1 }
  0x87   :  { %358 = vsyncpa [#allocation3 + $0x1], 1 }
  0x88   :  { %359 = vsyncpa [#allocation8], 1 }
  0x89   :  { %361 = vsyncpa [#allocation8 + $0x1], 1 }
  0x8a   :  { %362 = vsyncpa [#allocation4], 1 }
  0x8b   :  { %364 = vsyncpa [#allocation4 + $0x1], 1 }
  0x8c   :  { %365 = vsyncpa [#allocation5], 1 }
  0x8d   :  { %367 = vsyncpa [#allocation5 + $0x1], 1 }

</bundles_post_ra>
